<compile_context>
chip_gen: v5e
topology: v5e:2x2
jax: 0.10.0
libtpu: 0.0.40
codegen_flags: <defaults>
</compile_context>

<pallas_src>
import jax
import jax.numpy as jnp
from jax.experimental import pallas as pl
from jax.experimental.pallas import tpu as pltpu


def _round_up(x, m):
    return ((x + m - 1) // m) * m


# --------------------------------------------------------------------------- #
# Kernels
# --------------------------------------------------------------------------- #
def _proj_kernel(p_ref, w_ref, o_ref):
    """Full-K projection: (tm, K) @ (K, E) -> (tm, E), f32 MXU accumulation."""
    o_ref[...] = jnp.dot(
        p_ref[...], w_ref[...], preferred_element_type=jnp.float32
    ).astype(o_ref.dtype)


def _proj_kernel_ktiled(p_ref, w_ref, o_ref, acc_ref):
    """K-tiled projection with an f32 VMEM accumulator (VMEM-guard path)."""

    @pl.when(pl.program_id(1) == 0)
    def _init():
        acc_ref[...] = jnp.zeros_like(acc_ref)

    acc_ref[...] += jnp.dot(
        p_ref[...], w_ref[...], preferred_element_type=jnp.float32
    )

    @pl.when(pl.program_id(1) == pl.num_programs(1) - 1)
    def _finalize():
        o_ref[...] = acc_ref[...].astype(o_ref.dtype)


# Conservative double-buffered VMEM budget: fits v7x's 64 MiB physical VMEM
# (and is far under v5e/v6e's 128 MiB).
_DEFAULT_VMEM_BUDGET = 40 << 20


def _vmem_bytes(tm, tk, e, in_b, out_b, ktiled):
    b = 2 * tm * tk * in_b          # patch-row blocks (double-buffered)
    b += 2 * tk * e * in_b          # weight slab (conservatively counted x2)
    b += 2 * tm * e * out_b         # output tile
    if ktiled:
        b += tm * e * 4             # f32 accumulator scratch
    return b


def patch_embedding(x, weight, patch_size, *, compute_dtype=None,
                    out_dtype=None, vmem_budget_bytes=_DEFAULT_VMEM_BUDGET):
    """ViT patch embedding (stride=p, bias-free Conv2d + flatten + transpose).

    x: (B, C, H, W); weight: (E, C, p, p) in PyTorch OIHW layout.
    Returns (B, N, E) with N = (H//p) * (W//p).
    compute_dtype: optionally cast matmul inputs (jnp.bfloat16 recommended on
    v5e/v6e) while keeping f32 MXU accumulation; out_dtype defaults to x.dtype.
    """
    B, C, H, W = x.shape
    E = weight.shape[0]
    p = patch_size
    assert H % p == 0 and W % p == 0
    Hp, Wp = H // p, W // p
    N = Hp * Wp
    K = C * p * p
    M = B * N
    out_dtype = x.dtype if out_dtype is None else out_dtype
    cdtype = x.dtype if compute_dtype is None else compute_dtype

    # --- patch extraction (layout only; one XLA transpose pass) -------------
    # (B, C, Hp, p, Wp, p) -> (B, Hp, Wp, C, p, p) -> (M, K); the (c, a, b)
    # flatten order matches weight.reshape(E, C*p*p).
    # TODO(synk): fuse this NCHW->patch gather into the kernel (in-VMEM XLU
    # rearrangement over a (1, C, p, W) block) to drop this extra HBM pass;
    # the permutation crosses (8,128) tiles whenever patch_size % 8 != 0, so
    # the robust XLA path is kept for now.
    patches = x.reshape(B, C, Hp, p, Wp, p)
    patches = jnp.transpose(patches, (0, 2, 4, 1, 3, 5))
    if patches.dtype != cdtype:
        # Cast here so the materialized patches array is already narrow
        # (halves the HBM bytes of the transpose pass for bf16 compute).
        patches = patches.astype(cdtype)
    patches = patches.reshape(M, K)
    w = weight.reshape(E, K).T.astype(cdtype)   # (K, E): kernel does patches @ w

    in_b = jnp.dtype(cdtype).itemsize
    out_b = jnp.dtype(out_dtype).itemsize

    # --- tiling --------------------------------------------------------------
    # Row tile: big and MXU-friendly; equal to M for small problems so no
    # padding or boundary masking is needed at all.
    tm = M if M <= 512 else 512
    tk = K
    ktiled = False
    if _vmem_bytes(tm, tk, E, in_b, out_b, False) > vmem_budget_bytes:
        # VMEM guard (matters on v7x, 64 MiB): split the contraction axis.
        ktiled = True
        tk = _round_up(K, 128)
        while tk > 128 and _vmem_bytes(tm, tk, E, in_b, out_b, True) > vmem_budget_bytes:
            tk = _round_up(tk // 2, 128)
        while tm > 128 and _vmem_bytes(tm, tk, E, in_b, out_b, True) > vmem_budget_bytes:
            tm = max(128, _round_up(tm // 2, 8))

    grid_m = pl.cdiv(M, tm)

    if not ktiled:
        grid = (grid_m,)
        in_specs = [
            pl.BlockSpec((tm, K), lambda i: (i, 0)),   # patch rows (streamed)
            pl.BlockSpec((K, E), lambda i: (0, 0)),    # weight: resident, DMA'd once
        ]
        out_specs = pl.BlockSpec((tm, E), lambda i: (i, 0))
        scratch_shapes = []
        dim_sem = ("parallel",)
        kernel = _proj_kernel
        k_eff = K
        w_reads = 1
    else:
        k_pad = _round_up(K, tk)
        if k_pad != K:
            # Zero-pad the contraction axis so partial K blocks never mix
            # garbage into the accumulator (zeros are a no-op for the dot).
            patches = jnp.pad(patches, ((0, 0), (0, k_pad - K)))
            w = jnp.pad(w, ((0, k_pad - K), (0, 0)))
        nk = k_pad // tk
        grid = (grid_m, nk)
        in_specs = [
            pl.BlockSpec((tm, tk), lambda i, k: (i, k)),
            pl.BlockSpec((tk, E), lambda i, k: (k, 0)),
        ]
        out_specs = pl.BlockSpec((tm, E), lambda i, k: (i, 0))
        scratch_shapes = [pltpu.VMEM((tm, E), jnp.float32)]
        dim_sem = ("parallel", "arbitrary")
        kernel = _proj_kernel_ktiled
        k_eff = k_pad
        w_reads = grid_m

    est = _vmem_bytes(tm, tk, E, in_b, out_b, ktiled)
    vmem_limit = int(min(max(est * 4 // 3 + (1 << 20), 32 << 20), 56 << 20))

    # Accurate advisory cost: weight counted once in the resident path,
    # grid_m re-reads in the K-tiled fallback.
    cost = pl.CostEstimate(
        flops=2 * M * k_eff * E,
        transcendentals=0,
        bytes_accessed=M * k_eff * in_b + w_reads * k_eff * E * in_b + M * E * out_b,
    )

    out = pl.pallas_call(
        kernel,
        out_shape=jax.ShapeDtypeStruct((M, E), out_dtype),
        grid_spec=pltpu.PrefetchScalarGridSpec(
            num_scalar_prefetch=0,
            grid=grid,
            in_specs=in_specs,
            out_specs=out_specs,
            scratch_shapes=scratch_shapes,
        ),
        compiler_params=pltpu.CompilerParams(
            dimension_semantics=dim_sem,
            vmem_limit_bytes=vmem_limit,
        ),
        cost_estimate=cost,
    )(patches, w)

    # (M, E) is exact (no padding), so this reshape is free.  Matches
    # torch: proj(x).flatten(2).transpose(1, 2).
    return out.reshape(B, N, E)


def _reference(x, weight, patch_size):
    """Pure-JAX reference identical to the PyTorch forward."""
    y = jax.lax.conv_general_dilated(
        x, weight,
        window_strides=(patch_size, patch_size),
        padding="VALID",
        dimension_numbers=("NCHW", "OIHW", "NCHW"),
    )  # (B, E, Hp, Wp)
    B, E = y.shape[0], y.shape[1]
    y = y.reshape(B, E, -1)             # flatten(2)
    return jnp.transpose(y, (0, 2, 1))  # transpose(1, 2)


if __name__ == "__main__":
    key = jax.random.PRNGKey(0)
    kx, kw, kx2, kw2 = jax.random.split(key, 4)

    # 1) small config, simple resident-weight path (f32).
    B, C, H, W = 2, 4, 16, 16
    patch_size, embed_dim = 4, 32
    x = jax.random.normal(kx, (B, C, H, W), dtype=jnp.float32)
    weight = jax.random.normal(
        kw, (embed_dim, C, patch_size, patch_size), dtype=jnp.float32) * 0.02

    out = jax.block_until_ready(patch_embedding(x, weight, patch_size))
    ref = _reference(x, weight, patch_size)
    assert out.shape == (B, (H // patch_size) * (W // patch_size), embed_dim)
    assert jnp.allclose(out, ref, atol=1e-4, rtol=1e-4)

    # 2) bf16 compute fast path (v5e/v6e production default), f32 output.
    out_bf16 = jax.block_until_ready(
        patch_embedding(x, weight, patch_size, compute_dtype=jnp.bfloat16))
    assert out_bf16.shape == out.shape
    assert jnp.allclose(out_bf16.astype(jnp.float32), ref, atol=5e-2, rtol=5e-2)

    # 3) force the K-tiled VMEM-guard path (what v7x takes for large C*p*p)
    #    by shrinking the budget; checks the accumulator kernel end-to-end.
    B2, C2, H2, W2, p2, E2 = 2, 3, 32, 32, 8, 128
    x2 = jax.random.normal(kx2, (B2, C2, H2, W2), dtype=jnp.float32)
    weight2 = jax.random.normal(kw2, (E2, C2, p2, p2), dtype=jnp.float32) * 0.02
    out2 = jax.block_until_ready(
        patch_embedding(x2, weight2, p2, vmem_budget_bytes=1))
    ref2 = _reference(x2, weight2, p2)
    assert out2.shape == (B2, (H2 // p2) * (W2 // p2), E2)
    assert jnp.allclose(out2, ref2, atol=1e-3, rtol=1e-3)

    print("KERNEL_OK")
</pallas_src>

<mosaic_0001>
module attributes {stable_mosaic.version = 11 : i64} {
  func.func @_proj_kernel(%arg0: i32, %arg1: memref<32x64xf32, #tpu.memory_space<vmem>>, %arg2: memref<64x32xf32, #tpu.memory_space<vmem>>, %arg3: memref<32x32xf32, #tpu.memory_space<vmem>>) attributes {dimension_semantics = [#tpu.dimension_semantics<parallel>], iteration_bounds = array<i64: 1>, scalar_prefetch = 0 : i64, scratch_operands = 0 : i64, tpu.core_type = #tpu.core_type<tc>, window_params = [{transform_indices = @transform_0, window_bounds = array<i64: 32, 64>}, {pipeline_mode = #tpu.pipeline_mode<synchronous>, transform_indices = @transform_1, window_bounds = array<i64: 64, 32>}, {transform_indices = @transform_2, window_bounds = array<i64: 32, 32>}]} {
    %c0 = arith.constant 0 : index
    %c0_0 = arith.constant 0 : index
    %0 = vector.load %arg1[%c0, %c0_0] : memref<32x64xf32, #tpu.memory_space<vmem>>, vector<32x64xf32>
    %c0_1 = arith.constant 0 : index
    %c0_2 = arith.constant 0 : index
    %1 = vector.load %arg2[%c0_1, %c0_2] : memref<64x32xf32, #tpu.memory_space<vmem>>, vector<64x32xf32>
    %cst = arith.constant dense<0.000000e+00> : vector<32x32xf32>
    %2 = tpu.matmul %0, %1, %cst {dimension_numbers = #tpu.dot_dimension_numbers<[1], [0], [0], [1], [0, 0, 1, 1], [], []>} : vector<32x64xf32>, vector<64x32xf32>, vector<32x32xf32> -> vector<32x32xf32>
    %c0_3 = arith.constant 0 : index
    %c0_4 = arith.constant 0 : index
    %3 = vector.load %arg3[%c0_3, %c0_4] : memref<32x32xf32, #tpu.memory_space<vmem>>, vector<32x32xf32>
    tpu.vector_store %arg3[%c0_3, %c0_4], %2 {strides = array<i32>} : memref<32x32xf32, #tpu.memory_space<vmem>>, vector<32x32xf32>,
    return
  }
  func.func @transform_0(%arg0: i32) -> (i32, i32) {
    %c0_i32 = arith.constant 0 : i32
    %c0_i32_0 = arith.constant 0 : i32
    return %arg0, %c0_i32 : i32, i32
  }
  func.func @transform_1(%arg0: i32) -> (i32, i32) {
    %c0_i32 = arith.constant 0 : i32
    %c0_i32_0 = arith.constant 0 : i32
    %c0_i32_1 = arith.constant 0 : i32
    return %c0_i32, %c0_i32_0 : i32, i32
  }
  func.func @transform_2(%arg0: i32) -> (i32, i32) {
    %c0_i32 = arith.constant 0 : i32
    %c0_i32_0 = arith.constant 0 : i32
    return %arg0, %c0_i32 : i32, i32
  }
}

</mosaic_0001>

<bundles_post_ra>
// kernel: tpu_custom_call.1
= control target key start
LH: loop header
LB: loop body
LE: loop exit
PB: predicated region body
PF: predicated region fallthrough
CT: control target
= control target key end

     0   :  { %s203_s0 = inlined_call_operand.vmem [shape: f32[32,64], index: 0, kind: input, shape index: {}]   ;;  %s204_s1 = inlined_call_operand.vmem [shape: f32[64,32], index: 1, kind: input, shape index: {}]   ;;  %s205_s2 = inlined_call_operand.hbm [shape: f32[32,32], index: 2, kind: output, shape index: {}]  }
   0x1   :  { %v23_v0 = vld [vmem:[%s204_s1 + $0x38] sm:$0xff]  ;;  %v22_v1 = vld [vmem:[%s204_s1 + $0x30] sm:$0xff]  ;;  %v21_v2 = vld [vmem:[%s204_s1 + $0x28] sm:$0xff] }
   0x2   :  { %94 = vmatpush.msra.mxu2 %v23_v0  ;;  %95 = vmatpush.msra.mxu3 %v23_v0  ;;  %v20_v3 = vld [vmem:[%s204_s1 + $0x20] sm:$0xff] }
   0x3   :  { %45 = vmatpush.msra.mxu0 %v23_v0  ;;  %93 = vmatpush.msra.mxu1 %v23_v0 }
   0x4   :  { %97 = vmatpush.msra.mxu2 %v22_v1  ;;  %98 = vmatpush.msra.mxu3 %v22_v1 }
   0x5   :  { %46 = vmatpush.msra.mxu0 %v22_v1  ;;  %96 = vmatpush.msra.mxu1 %v22_v1 }
   0x6   :  { %7 = vsyncpa [#allocation3], 0  ;;  %100 = vmatpush.msra.mxu2 %v21_v2  ;;  %101 = vmatpush.msra.mxu3 %v21_v2  ;;  %v19_v4 = vld [vmem:[%s204_s1 + $0x18] sm:$0xff]  ;;  %v18_v5 = vld [vmem:[%s204_s1 + $0x10] sm:$0xff]  ;;  %vm24_vm0 = vcmask 523264   ;;  %vm66_vm1 = vcmask 261120  }
   0x7   :  { %47 = vmatpush.msra.mxu0 %v21_v2  ;;  %99 = vmatpush.msra.mxu1 %v21_v2  ;;  %v17_v6 = vld [vmem:[%s204_s1 + $0x8] sm:$0xff]  ;;  %v16_v7 = vld [vmem:[%s204_s1] sm:$0xff]  ;;  %v14_v8 = vld [vmem:[%s203_s0 + $0x10] sm:$0xff]  ;;  %s146_s4 = smov [#allocation2]   ;;  %s77_s8 = sshll.u32 %s205_s2, 4  ;;  %s78_s8 = int_to_ptr.hbm [resolvable:$true] %s77_s8 }
   0x8   :  { %103 = vmatpush.msra.mxu2 %v20_v3  ;;  %104 = vmatpush.msra.mxu3 %v20_v3  ;;  %v15_v9 = vld [vmem:[%s203_s0 + $0x18] sm:$0xff]  ;;  %v12_v10 = vld [vmem:[%s203_s0] sm:$0xff]  ;;  %v13_v11 = vld [vmem:[%s203_s0 + $0x8] sm:$0xff]  ;;  %s75_s5 = sshll.u32 %s146_s4, 4  ;;  %s147_s0 = smov 128   ;;  %s76_s5 = int_to_ptr.vmem [resolvable:$true] %s75_s5 }
   0x9   :  { %48 = vmatpush.msra.mxu0 %v20_v3  ;;  %102 = vmatpush.msra.mxu1 %v20_v3  ;;  %s148_s9 = smov 8  }
   0xa   :  { %106 = vmatpush.msra.mxu2 %v19_v4  ;;  %107 = vmatpush.msra.mxu3 %v19_v4 }
   0xb   :  { %49 = vmatpush.msra.mxu0 %v19_v4  ;;  %105 = vmatpush.msra.mxu1 %v19_v4 }
   0xc   :  { %109 = vmatpush.msra.mxu2 %v18_v5  ;;  %110 = vmatpush.msra.mxu3 %v18_v5 }
   0xd   :  { %50 = vmatpush.msra.mxu0 %v18_v5  ;;  %108 = vmatpush.msra.mxu1 %v18_v5 }
   0xe   :  { %112 = vmatpush.msra.mxu2 %v17_v6  ;;  %113 = vmatpush.msra.mxu3 %v17_v6 }
   0xf   :  { %51 = vmatpush.msra.mxu0 %v17_v6  ;;  %111 = vmatpush.msra.mxu1 %v17_v6 }
  0x10   :  { %115 = vmatpush.msra.mxu2 %v16_v7  ;;  %116 = vmatpush.msra.mxu3 %v16_v7 }
  0x11   :  { %91 = vmatmul.msk.f32.vlgmr.msra.gmra.mxu2 %vm24_vm0, %v14_v8  ;;  %92 = vmatmul.msk.f32.vlgmr.msra.gmra.mxu3 %vm24_vm0, %v15_v9 }
  0x12   :  { %52 = vmatpush.msra.mxu0 %v16_v7  ;;  %114 = vmatpush.msra.mxu1 %v16_v7 }
  0x13   :  { %89 = vmatmul.msk.f32.vlgmr.msra.gmra.mxu0 %vm24_vm0, %v12_v10  ;;  %90 = vmatmul.msk.f32.vlgmr.msra.gmra.mxu1 %vm24_vm0, %v13_v11 }
  0x90   :  { %v54_v12 = vpop.f32.mrf.mxu0  ;;  %v57_v13 = vpop.f32.mrf.mxu1 }
  0x91   :  { %67 = vst.msk [vmem:[#allocation2] sm:$0xff] %vm66_vm1, %v54_v12 }
  0x92   :  { %68 = vst.msk [vmem:[#allocation2 + $0x8] sm:$0xff] %vm66_vm1, %v57_v13 }
  0x94   :  { %v60_v14 = vpop.f32.mrf.mxu2  ;;  %v63_v15 = vpop.f32.mrf.mxu3 }
  0x95   :  { %69 = vst.msk [vmem:[#allocation2 + $0x10] sm:$0xff] %vm66_vm1, %v60_v14 }
  0x96   :  { %70 = vst.msk [vmem:[#allocation2 + $0x18] sm:$0xff] %vm66_vm1, %v63_v15 }
  0x97   :  { %83 = dma.vmem_to_hbm [thread:$0]  %s76_s5, 512, %s78_s8, [#allocation3], %s147_s0, %s147_s0, %s148_s9  }
  0x98   :  { %144 = dma.done.wait [#allocation3], 512  }
  0x99   :  { %145 = vsyncadd [#allocation3], 4294966784 }
  0x9a   :  { %88 = vsyncpa [#allocation3], 1 }

</bundles_post_ra>
